<compile_context>
chip_gen: v5e
topology: v5e:2x2
jax: 0.10.0
libtpu: 0.0.40
codegen_flags: <defaults>
</compile_context>

<pallas_src>
import math
import functools

import jax
import jax.numpy as jnp
import numpy as np
from jax.experimental import pallas as pl
from jax.experimental.pallas import tpu as pltpu


# ----------------------------- config ---------------------------------------
N_EMBD = 32
N_HEAD = 4
HEAD_DIM = N_EMBD // N_HEAD
SEQ_LEN = 8
BATCH = 2


# ----------------------------- kernel ---------------------------------------
def attn_kernel(
    x_ref,        # (T, C)      one batch element (batch dim squeezed by grid)
    w_qkv_ref,    # (C, 3C)     [Q|K|V] columns, Q columns pre-scaled by 1/sqrt(hd)
    b_qkv_ref,    # (1, 3C)
    w_proj_ref,   # (C, C)
    b_proj_ref,   # (1, C)
    out_ref,      # (T, C)
    *, n_head, head_dim, seq_len, approx_recip=True,
):
    T = seq_len
    C = n_head * head_dim

    x = x_ref[...]                                                  # (T, C)

    # Fused QKV projection: single dense 2D MXU matmul, K=C.
    qkv = jnp.dot(x, w_qkv_ref[...], preferred_element_type=jnp.float32)
    qkv = qkv + b_qkv_ref[...]                                      # (T, 3C)

    # Causal additive mask generated in-kernel (no HBM mask input, no B^2*T^2 read).
    row = jax.lax.broadcasted_iota(jnp.int32, (T, T), 0)
    col = jax.lax.broadcasted_iota(jnp.int32, (T, T), 1)
    causal_bias = jnp.where(col <= row, 0.0, -1e30).astype(jnp.float32)

    # Per-head attention on (T, T) score tiles.  n_head is tiny & static, so the
    # Python loop fully unrolls; q already carries the 1/sqrt(hd) scale.
    ys = []
    for h in range(n_head):
        lo, hi = h * head_dim, (h + 1) * head_dim
        q = qkv[:, lo:hi]                                           # (T, hd)
        k = qkv[:, C + lo:C + hi]                                   # (T, hd)
        v = qkv[:, 2 * C + lo:2 * C + hi]                           # (T, hd)

        s = jax.lax.dot_general(q, k, (((1,), (1,)), ((), ())),
                                preferred_element_type=jnp.float32)  # (T, T)
        s = s + causal_bias

        # numerically stable softmax; reciprocal goes to the EUP slot
        s = s - jnp.max(s, axis=-1, keepdims=True)
        p = jnp.exp(s)
        denom = jnp.sum(p, axis=-1, keepdims=True)
        if approx_recip:
            p = p * pl.reciprocal(denom, approx=True)
        else:
            p = p / denom

        ys.append(jnp.dot(p, v, preferred_element_type=jnp.float32))  # (T, hd)

    # Head merge: lane-axis concat, then ONE (T,C)@(C,C) output projection.
    y = jnp.concatenate(ys, axis=-1)                                # (T, C)
    out = jnp.dot(y, w_proj_ref[...], preferred_element_type=jnp.float32)
    out = out + b_proj_ref[...]

    out_ref[...] = out.astype(out_ref.dtype)


# ------------------------ one-time parameter prep ----------------------------
def prepare_attention_params(params, n_head=N_HEAD):
    """Call ONCE at init, not per forward.  Folds the softmax scale into Q."""
    w_attn = jnp.asarray(params["w_attn"], jnp.float32)     # (C, 3C), [Q|K|V]
    b_attn = jnp.asarray(params["b_attn"], jnp.float32)     # (3C,)
    w_proj = jnp.asarray(params["w_proj"], jnp.float32)     # (C, C)
    b_proj = jnp.asarray(params["b_proj"], jnp.float32)     # (C,)

    C = w_attn.shape[0]
    hd = C // n_head
    scale = 1.0 / math.sqrt(hd)

    # Fold 1/sqrt(head_dim) into the Q weight columns and the Q bias.
    col_scale = jnp.concatenate(
        [jnp.full((C,), scale, jnp.float32), jnp.ones((2 * C,), jnp.float32)])
    w_qkv = w_attn * col_scale[None, :]
    b_qkv = (b_attn * col_scale).reshape(1, 3 * C)

    return {
        "w_qkv": w_qkv,
        "b_qkv": b_qkv,
        "w_proj": w_proj,
        "b_proj": b_proj.reshape(1, C),
    }


# ----------------------------- wrapper ---------------------------------------
def causal_self_attention_forward(x, prepped, n_head=N_HEAD):
    B, T, C = x.shape
    hd = C // n_head

    kern = functools.partial(attn_kernel, n_head=n_head, head_dim=hd, seq_len=T)

    return pl.pallas_call(
        kern,
        out_shape=jax.ShapeDtypeStruct((B, T, C), x.dtype),
        grid=(B,),
        in_specs=[
            pl.BlockSpec((None, T, C), lambda b: (b, 0, 0)),   # x, one batch elem
            pl.BlockSpec((C, 3 * C), lambda b: (0, 0)),        # weights: constant
            pl.BlockSpec((1, 3 * C), lambda b: (0, 0)),        # block index -> not
            pl.BlockSpec((C, C), lambda b: (0, 0)),            # re-DMA'd per step
            pl.BlockSpec((1, C), lambda b: (0, 0)),
        ],
        out_specs=pl.BlockSpec((None, T, C), lambda b: (b, 0, 0)),
        compiler_params=pltpu.CompilerParams(
            dimension_semantics=("parallel",)),                # 2 TCs on v7x
    )(x, prepped["w_qkv"], prepped["b_qkv"], prepped["w_proj"], prepped["b_proj"])


# ------------------------- pure-JAX reference --------------------------------
def attention_reference(x, params):
    B, T, C = x.shape
    H, hd = N_HEAD, C // N_HEAD
    qkv = x @ params["w_attn"] + params["b_attn"]
    q, k, v = jnp.split(qkv, 3, axis=-1)
    q = q.reshape(B, T, H, hd).transpose(0, 2, 1, 3)
    k = k.reshape(B, T, H, hd).transpose(0, 2, 1, 3)
    v = v.reshape(B, T, H, hd).transpose(0, 2, 1, 3)
    s = jnp.einsum("bhqd,bhkd->bhqk", q, k) / math.sqrt(hd)
    mask = jnp.tril(jnp.ones((T, T), dtype=bool))
    s = jnp.where(mask, s, -jnp.inf)
    a = jax.nn.softmax(s, axis=-1)
    y = jnp.einsum("bhqk,bhkd->bhqd", a, v)
    y = y.transpose(0, 2, 1, 3).reshape(B, T, C)
    return y @ params["w_proj"] + params["b_proj"]


# ----------------------------- main ------------------------------------------
if __name__ == "__main__":
    key = jax.random.PRNGKey(0)
    keys = jax.random.split(key, 8)
    C = N_EMBD

    params = {
        "w_attn": 0.02 * jax.random.normal(keys[0], (C, 3 * C), jnp.float32),
        "b_attn": 0.01 * jax.random.normal(keys[1], (3 * C,), jnp.float32),
        "w_proj": 0.02 * jax.random.normal(keys[2], (C, C), jnp.float32),
        "b_proj": 0.01 * jax.random.normal(keys[3], (C,), jnp.float32),
    }

    # One-time prep (hoisted out of the per-call path).
    prepped = prepare_attention_params(params)

    x = jax.random.normal(keys[4], (BATCH, SEQ_LEN, C), jnp.float32)

    out = jax.block_until_ready(causal_self_attention_forward(x, prepped))
    ref = jax.block_until_ready(attention_reference(x, params))

    np.testing.assert_allclose(np.asarray(out), np.asarray(ref),
                               rtol=1e-2, atol=1e-2)

    print("KERNEL_OK")
</pallas_src>

<mosaic_0001>
module attributes {stable_mosaic.version = 11 : i64} {
  func.func @attn_kernel(%arg0: i32, %arg1: memref<1x8x32xf32, #tpu.memory_space<vmem>>, %arg2: memref<32x96xf32, #tpu.memory_space<vmem>>, %arg3: memref<1x96xf32, #tpu.memory_space<vmem>>, %arg4: memref<32x32xf32, #tpu.memory_space<vmem>>, %arg5: memref<1x32xf32, #tpu.memory_space<vmem>>, %arg6: memref<1x8x32xf32, #tpu.memory_space<vmem>>) attributes {dimension_semantics = [#tpu.dimension_semantics<parallel>], iteration_bounds = array<i64: 2>, scalar_prefetch = 0 : i64, scratch_operands = 0 : i64, tpu.core_type = #tpu.core_type<tc>, window_params = [{transform_indices = @transform_0, window_bounds = array<i64: 1, 8, 32>}, {pipeline_mode = #tpu.pipeline_mode<synchronous>, transform_indices = @transform_1, window_bounds = array<i64: 32, 96>}, {pipeline_mode = #tpu.pipeline_mode<synchronous>, transform_indices = @transform_2, window_bounds = array<i64: 1, 96>}, {pipeline_mode = #tpu.pipeline_mode<synchronous>, transform_indices = @transform_3, window_bounds = array<i64: 32, 32>}, {pipeline_mode = #tpu.pipeline_mode<synchronous>, transform_indices = @transform_4, window_bounds = array<i64: 1, 32>}, {transform_indices = @transform_5, window_bounds = array<i64: 1, 8, 32>}]} {
    %c0 = arith.constant 0 : index
    %c0_0 = arith.constant 0 : index
    %c0_1 = arith.constant 0 : index
    %0 = vector.load %arg1[%c0, %c0_0, %c0_1] : memref<1x8x32xf32, #tpu.memory_space<vmem>>, vector<1x8x32xf32>
    %1 = vector.shape_cast %0 : vector<1x8x32xf32> to vector<8x32xf32>
    %c0_2 = arith.constant 0 : index
    %c0_3 = arith.constant 0 : index
    %2 = vector.load %arg2[%c0_2, %c0_3] : memref<32x96xf32, #tpu.memory_space<vmem>>, vector<32x96xf32>
    %cst = arith.constant dense<0.000000e+00> : vector<8x96xf32>
    %3 = tpu.matmul %1, %2, %cst {dimension_numbers = #tpu.dot_dimension_numbers<[1], [0], [0], [1], [0, 0, 1, 1], [], []>} : vector<8x32xf32>, vector<32x96xf32>, vector<8x96xf32> -> vector<8x96xf32>
    %c0_4 = arith.constant 0 : index
    %c0_5 = arith.constant 0 : index
    %4 = vector.load %arg3[%c0_4, %c0_5] : memref<1x96xf32, #tpu.memory_space<vmem>>, vector<1x96xf32>
    %5 = vector.broadcast %4 : vector<1x96xf32> to vector<8x96xf32>
    %6 = arith.addf %3, %5 : vector<8x96xf32>
    %7 = tpu.iota {dimensions = array<i32: 0>} : vector<8x8xi32>
    %8 = tpu.iota {dimensions = array<i32: 1>} : vector<8x8xi32>
    %9 = arith.cmpi sle, %8, %7 : vector<8x8xi32>
    %cst_6 = arith.constant 0.000000e+00 : f32
    %cst_7 = arith.constant -1.000000e+30 : f32
    %10 = vector.broadcast %cst_6 : f32 to vector<8x8xf32>
    %11 = vector.broadcast %cst_7 : f32 to vector<8x8xf32>
    %12 = arith.select %9, %10, %11 : vector<8x8xi1>, vector<8x8xf32>
    %13 = vector.extract_strided_slice %6 {offsets = [0, 0], sizes = [8, 8], strides = [1, 1]} : vector<8x96xf32> to vector<8x8xf32>
    %14 = vector.extract_strided_slice %6 {offsets = [0, 32], sizes = [8, 8], strides = [1, 1]} : vector<8x96xf32> to vector<8x8xf32>
    %15 = vector.extract_strided_slice %6 {offsets = [0, 64], sizes = [8, 8], strides = [1, 1]} : vector<8x96xf32> to vector<8x8xf32>
    %cst_8 = arith.constant dense<0.000000e+00> : vector<8x8xf32>
    %16 = tpu.matmul %13, %14, %cst_8 {dimension_numbers = #tpu.dot_dimension_numbers<[1], [1], [0], [0], [0, 0, 1, 0], [], []>} : vector<8x8xf32>, vector<8x8xf32>, vector<8x8xf32> -> vector<8x8xf32>
    %17 = arith.addf %16, %12 : vector<8x8xf32>
    %cst_9 = arith.constant dense<0xFF800000> : vector<8xf32>
    %18 = vector.multi_reduction <maximumf>, %17, %cst_9 [1] : vector<8x8xf32> to vector<8xf32>
    %19 = vector.shape_cast %18 : vector<8xf32> to vector<8x1xf32>
    %20 = vector.broadcast %19 : vector<8x1xf32> to vector<8x8xf32>
    %21 = arith.subf %17, %20 : vector<8x8xf32>
    %22 = math.exp %21 : vector<8x8xf32>
    %cst_10 = arith.constant dense<0.000000e+00> : vector<8xf32>
    %23 = vector.multi_reduction <add>, %22, %cst_10 [1] : vector<8x8xf32> to vector<8xf32>
    %24 = vector.shape_cast %23 : vector<8xf32> to vector<8x1xf32>
    %25 = tpu.reciprocal %24 {approx = true} : vector<8x1xf32> -> vector<8x1xf32>
    %26 = vector.broadcast %25 : vector<8x1xf32> to vector<8x8xf32>
    %27 = arith.mulf %22, %26 : vector<8x8xf32>
    %cst_11 = arith.constant dense<0.000000e+00> : vector<8x8xf32>
    %28 = tpu.matmul %27, %15, %cst_11 {dimension_numbers = #tpu.dot_dimension_numbers<[1], [0], [0], [1], [0, 0, 1, 1], [], []>} : vector<8x8xf32>, vector<8x8xf32>, vector<8x8xf32> -> vector<8x8xf32>
    %29 = vector.extract_strided_slice %6 {offsets = [0, 8], sizes = [8, 8], strides = [1, 1]} : vector<8x96xf32> to vector<8x8xf32>
    %30 = vector.extract_strided_slice %6 {offsets = [0, 40], sizes = [8, 8], strides = [1, 1]} : vector<8x96xf32> to vector<8x8xf32>
    %31 = vector.extract_strided_slice %6 {offsets = [0, 72], sizes = [8, 8], strides = [1, 1]} : vector<8x96xf32> to vector<8x8xf32>
    %cst_12 = arith.constant dense<0.000000e+00> : vector<8x8xf32>
    %32 = tpu.matmul %29, %30, %cst_12 {dimension_numbers = #tpu.dot_dimension_numbers<[1], [1], [0], [0], [0, 0, 1, 0], [], []>} : vector<8x8xf32>, vector<8x8xf32>, vector<8x8xf32> -> vector<8x8xf32>
    %33 = arith.addf %32, %12 : vector<8x8xf32>
    %cst_13 = arith.constant dense<0xFF800000> : vector<8xf32>
    %34 = vector.multi_reduction <maximumf>, %33, %cst_13 [1] : vector<8x8xf32> to vector<8xf32>
    %35 = vector.shape_cast %34 : vector<8xf32> to vector<8x1xf32>
    %36 = vector.broadcast %35 : vector<8x1xf32> to vector<8x8xf32>
    %37 = arith.subf %33, %36 : vector<8x8xf32>
    %38 = math.exp %37 : vector<8x8xf32>
    %cst_14 = arith.constant dense<0.000000e+00> : vector<8xf32>
    %39 = vector.multi_reduction <add>, %38, %cst_14 [1] : vector<8x8xf32> to vector<8xf32>
    %40 = vector.shape_cast %39 : vector<8xf32> to vector<8x1xf32>
    %41 = tpu.reciprocal %40 {approx = true} : vector<8x1xf32> -> vector<8x1xf32>
    %42 = vector.broadcast %41 : vector<8x1xf32> to vector<8x8xf32>
    %43 = arith.mulf %38, %42 : vector<8x8xf32>
    %cst_15 = arith.constant dense<0.000000e+00> : vector<8x8xf32>
    %44 = tpu.matmul %43, %31, %cst_15 {dimension_numbers = #tpu.dot_dimension_numbers<[1], [0], [0], [1], [0, 0, 1, 1], [], []>} : vector<8x8xf32>, vector<8x8xf32>, vector<8x8xf32> -> vector<8x8xf32>
    %45 = vector.extract_strided_slice %6 {offsets = [0, 16], sizes = [8, 8], strides = [1, 1]} : vector<8x96xf32> to vector<8x8xf32>
    %46 = vector.extract_strided_slice %6 {offsets = [0, 48], sizes = [8, 8], strides = [1, 1]} : vector<8x96xf32> to vector<8x8xf32>
    %47 = vector.extract_strided_slice %6 {offsets = [0, 80], sizes = [8, 8], strides = [1, 1]} : vector<8x96xf32> to vector<8x8xf32>
    %cst_16 = arith.constant dense<0.000000e+00> : vector<8x8xf32>
    %48 = tpu.matmul %45, %46, %cst_16 {dimension_numbers = #tpu.dot_dimension_numbers<[1], [1], [0], [0], [0, 0, 1, 0], [], []>} : vector<8x8xf32>, vector<8x8xf32>, vector<8x8xf32> -> vector<8x8xf32>
    %49 = arith.addf %48, %12 : vector<8x8xf32>
    %cst_17 = arith.constant dense<0xFF800000> : vector<8xf32>
    %50 = vector.multi_reduction <maximumf>, %49, %cst_17 [1] : vector<8x8xf32> to vector<8xf32>
    %51 = vector.shape_cast %50 : vector<8xf32> to vector<8x1xf32>
    %52 = vector.broadcast %51 : vector<8x1xf32> to vector<8x8xf32>
    %53 = arith.subf %49, %52 : vector<8x8xf32>
    %54 = math.exp %53 : vector<8x8xf32>
    %cst_18 = arith.constant dense<0.000000e+00> : vector<8xf32>
    %55 = vector.multi_reduction <add>, %54, %cst_18 [1] : vector<8x8xf32> to vector<8xf32>
    %56 = vector.shape_cast %55 : vector<8xf32> to vector<8x1xf32>
    %57 = tpu.reciprocal %56 {approx = true} : vector<8x1xf32> -> vector<8x1xf32>
    %58 = vector.broadcast %57 : vector<8x1xf32> to vector<8x8xf32>
    %59 = arith.mulf %54, %58 : vector<8x8xf32>
    %cst_19 = arith.constant dense<0.000000e+00> : vector<8x8xf32>
    %60 = tpu.matmul %59, %47, %cst_19 {dimension_numbers = #tpu.dot_dimension_numbers<[1], [0], [0], [1], [0, 0, 1, 1], [], []>} : vector<8x8xf32>, vector<8x8xf32>, vector<8x8xf32> -> vector<8x8xf32>
    %61 = vector.extract_strided_slice %6 {offsets = [0, 24], sizes = [8, 8], strides = [1, 1]} : vector<8x96xf32> to vector<8x8xf32>
    %62 = vector.extract_strided_slice %6 {offsets = [0, 56], sizes = [8, 8], strides = [1, 1]} : vector<8x96xf32> to vector<8x8xf32>
    %63 = vector.extract_strided_slice %6 {offsets = [0, 88], sizes = [8, 8], strides = [1, 1]} : vector<8x96xf32> to vector<8x8xf32>
    %cst_20 = arith.constant dense<0.000000e+00> : vector<8x8xf32>
    %64 = tpu.matmul %61, %62, %cst_20 {dimension_numbers = #tpu.dot_dimension_numbers<[1], [1], [0], [0], [0, 0, 1, 0], [], []>} : vector<8x8xf32>, vector<8x8xf32>, vector<8x8xf32> -> vector<8x8xf32>
    %65 = arith.addf %64, %12 : vector<8x8xf32>
    %cst_21 = arith.constant dense<0xFF800000> : vector<8xf32>
    %66 = vector.multi_reduction <maximumf>, %65, %cst_21 [1] : vector<8x8xf32> to vector<8xf32>
    %67 = vector.shape_cast %66 : vector<8xf32> to vector<8x1xf32>
    %68 = vector.broadcast %67 : vector<8x1xf32> to vector<8x8xf32>
    %69 = arith.subf %65, %68 : vector<8x8xf32>
    %70 = math.exp %69 : vector<8x8xf32>
    %cst_22 = arith.constant dense<0.000000e+00> : vector<8xf32>
    %71 = vector.multi_reduction <add>, %70, %cst_22 [1] : vector<8x8xf32> to vector<8xf32>
    %72 = vector.shape_cast %71 : vector<8xf32> to vector<8x1xf32>
    %73 = tpu.reciprocal %72 {approx = true} : vector<8x1xf32> -> vector<8x1xf32>
    %74 = vector.broadcast %73 : vector<8x1xf32> to vector<8x8xf32>
    %75 = arith.mulf %70, %74 : vector<8x8xf32>
    %cst_23 = arith.constant dense<0.000000e+00> : vector<8x8xf32>
    %76 = tpu.matmul %75, %63, %cst_23 {dimension_numbers = #tpu.dot_dimension_numbers<[1], [0], [0], [1], [0, 0, 1, 1], [], []>} : vector<8x8xf32>, vector<8x8xf32>, vector<8x8xf32> -> vector<8x8xf32>
    %77 = tpu.concatenate %28, %44, %60, %76 in 1 : vector<8x8xf32>, vector<8x8xf32>, vector<8x8xf32>, vector<8x8xf32> -> vector<8x32xf32>
    %c0_24 = arith.constant 0 : index
    %c0_25 = arith.constant 0 : index
    %78 = vector.load %arg4[%c0_24, %c0_25] : memref<32x32xf32, #tpu.memory_space<vmem>>, vector<32x32xf32>
    %cst_26 = arith.constant dense<0.000000e+00> : vector<8x32xf32>
    %79 = tpu.matmul %77, %78, %cst_26 {dimension_numbers = #tpu.dot_dimension_numbers<[1], [0], [0], [1], [0, 0, 1, 1], [], []>} : vector<8x32xf32>, vector<32x32xf32>, vector<8x32xf32> -> vector<8x32xf32>
    %c0_27 = arith.constant 0 : index
    %c0_28 = arith.constant 0 : index
    %80 = vector.load %arg5[%c0_27, %c0_28] : memref<1x32xf32, #tpu.memory_space<vmem>>, vector<1x32xf32>
    %81 = vector.broadcast %80 : vector<1x32xf32> to vector<8x32xf32>
    %82 = arith.addf %79, %81 : vector<8x32xf32>
    %c0_29 = arith.constant 0 : index
    %c0_30 = arith.constant 0 : index
    %c0_31 = arith.constant 0 : index
    %83 = vector.load %arg6[%c0_29, %c0_30, %c0_31] : memref<1x8x32xf32, #tpu.memory_space<vmem>>, vector<1x8x32xf32>
    %84 = vector.shape_cast %83 : vector<1x8x32xf32> to vector<8x32xf32>
    %85 = vector.shape_cast %82 : vector<8x32xf32> to vector<1x8x32xf32>
    tpu.vector_store %arg6[%c0_29, %c0_30, %c0_31], %85 {strides = array<i32>} : memref<1x8x32xf32, #tpu.memory_space<vmem>>, vector<1x8x32xf32>,
    return
  }
  func.func @transform_0(%arg0: i32) -> (i32, i32, i32) {
    %c0_i32 = arith.constant 0 : i32
    %c0_i32_0 = arith.constant 0 : i32
    %c0_i32_1 = arith.constant 0 : i32
    return %arg0, %c0_i32, %c0_i32_0 : i32, i32, i32
  }
  func.func @transform_1(%arg0: i32) -> (i32, i32) {
    %c0_i32 = arith.constant 0 : i32
    %c0_i32_0 = arith.constant 0 : i32
    %c0_i32_1 = arith.constant 0 : i32
    return %c0_i32, %c0_i32_0 : i32, i32
  }
  func.func @transform_2(%arg0: i32) -> (i32, i32) {
    %c0_i32 = arith.constant 0 : i32
    %c0_i32_0 = arith.constant 0 : i32
    %c0_i32_1 = arith.constant 0 : i32
    return %c0_i32, %c0_i32_0 : i32, i32
  }
  func.func @transform_3(%arg0: i32) -> (i32, i32) {
    %c0_i32 = arith.constant 0 : i32
    %c0_i32_0 = arith.constant 0 : i32
    %c0_i32_1 = arith.constant 0 : i32
    return %c0_i32, %c0_i32_0 : i32, i32
  }
  func.func @transform_4(%arg0: i32) -> (i32, i32) {
    %c0_i32 = arith.constant 0 : i32
    %c0_i32_0 = arith.constant 0 : i32
    %c0_i32_1 = arith.constant 0 : i32
    return %c0_i32, %c0_i32_0 : i32, i32
  }
  func.func @transform_5(%arg0: i32) -> (i32, i32, i32) {
    %c0_i32 = arith.constant 0 : i32
    %c0_i32_0 = arith.constant 0 : i32
    %c0_i32_1 = arith.constant 0 : i32
    return %arg0, %c0_i32, %c0_i32_0 : i32, i32, i32
  }
}

</mosaic_0001>

<bundles_post_ra>
// kernel: tpu_custom_call.1
= control target key start
LH: loop header
LB: loop body
LE: loop exit
PB: predicated region body
PF: predicated region fallthrough
CT: control target
= control target key end

     0   :  { %10 = vsyncpa [#allocation3], 0  ;;  %s1264_s0 = inlined_call_operand.hbm [shape: f32[2,8,32], index: 0, kind: input, shape index: {}]   ;;  %s1265_s1 = inlined_call_operand.hbm [shape: f32[32,96], index: 1, kind: input, shape index: {}]   ;;  %s1266_s2 = inlined_call_operand.vmem [shape: f32[1,96], index: 2, kind: input, shape index: {}]   ;;  %s1267_s3 = inlined_call_operand.hbm [shape: f32[32,32], index: 3, kind: input, shape index: {}]   ;;  %s1268_s4 = inlined_call_operand.vmem [shape: f32[1,32], index: 4, kind: input, shape index: {}]   ;;  %s1269_s5 = inlined_call_operand.hbm [shape: f32[2,8,32], index: 5, kind: output, shape index: {}]  }
   0x1   :  { %12 = vsyncpa [#allocation3 + $0x1], 0 }
   0x2   :  { %13 = vsyncpa [#allocation6], 0 }
   0x3   :  { %14 = vsyncpa [#allocation4], 0 }
   0x4   :  { %16 = vsyncpa [#allocation4 + $0x1], 0  ;;  %s1071_s18 = smov 0   ;;  %s1073_s19 = smov 0  }
   0x5   :  { %s1075_s20 = smov 0   ;;  %s1077_s21 = smov 0  }
   0x6 LB: > { %s174_s24 = sshll.u32 %s1265_s1, 4  ;;  %s1095_s25 = sadd.s32 4294967295, %s1020_s21   ;;  %s1020_s21 = sphi %s1077_s21, %s1280_s21   ;;  %s1016_s20 = sphi %s1075_s20, %s1279_s20   ;;  %s1012_s19 = sphi %s1073_s19, %s1278_s19   ;;  %s1008_s18 = sphi %s1071_s18, %s1277_s18   ;;  %s175_s24 = int_to_ptr.hbm [resolvable:$true] %s174_s24 }
   0x7   : > { %p729_p0 = scmp.ge.s32.totalorder %s1020_s21, 1  ;;  %p43_p1 = scmp.eq.s32.totalorder %s1095_s25, 0 }
   0x8   : > { %p163_p2 = scmp.lt.s32.totalorder %s1020_s21, 3  ;;  %s1022_s27 = smov [#allocation5]  }
   0x9   : > { %s176_s28 = sshll.u32 %s1022_s27, 4  ;;  %s191_s6 = sshll.u32 %s1267_s3, 4  ;;  %s177_s28 = int_to_ptr.vmem [resolvable:$true] %s176_s28  ;;  %s192_s6 = int_to_ptr.hbm [resolvable:$true] %s191_s6 }
   0xa   : > { %p1100_p3 = pnand %p729_p0, %p163_p2  ;;  %s1023_s7 = smov [#allocation7]  }
   0xb   : > { %s193_s8 = sshll.u32 %s1023_s7, 4  ;;  %s1024_s9 = smov 128   ;;  %s194_s8 = int_to_ptr.vmem [resolvable:$true] %s193_s8 }
   0xc   : > { %p770_p4 = pneg %p1100_p3  ;;  %s1025_s10 = smov 8  }
   0xd   : > { %s728_s11 = sadd.s32 4294967294, %s1020_s21   ;;  %s1114_s12 = sadd.s32 1, %s1020_s21  }
   0xe   : > { %p771_p6 = pnand %p770_p4, %p43_p1  ;;  %s26_s13 = ssub.s32 %s1020_s21, %s1114_s12 }
   0xf   : > { %s29_s14 = sadd.s32 1, %s1016_s20  ;;  %p27_p7 = scmp.eq.s32.totalorder %s26_s13, 0 }
  0x10   : > { %773 = dma.hbm_to_vmem [thread:$0]  (!%p771_p6), %s175_s24, 512, %s177_s28, [#allocation6], %s1024_s9, %s1024_s9, %s1025_s10  }
  0x11   : > { %776 = dma.hbm_to_vmem [thread:$0]  (!%p771_p6), %s192_s6, 512, %s194_s8, [#allocation6], %s1024_s9, %s1024_s9, %s1025_s10  }
  0x12   : > { %p36_p8 = scmp.ne.s32.totalorder %s1016_s20, %s1012_s19  ;;  %p37_p9 = scmp.eq.s32.totalorder %s1020_s21, 0 }
  0x13   : > { %p42_p10 = scmp.ne.s32.totalorder %s1012_s19, %s1008_s18  ;;  %p150_p13 = scmp.eq.s32.totalorder %s1095_s25, 1 }
  0x14   : > { %s1125_s15 = scalar_select %p27_p7, %s1016_s20, %s29_s14  }
  0x15   : > { %p1127_p11 = por %p37_p9, %p36_p8  ;;  %p1133_p12 = por %p43_p1, %p42_p10 }
  0x16   : > { %p156_p0 = scmp.eq.s32.totalorder %s728_s11, 1  ;;  %p787_p2 = scmp.lt.s32.totalorder %s1020_s21, 2 }
  0x17   : > { %s210_s22 = sand.u32 1, %s1016_s20   ;;  %p1140_p4 = por %p150_p13, %p36_p8 }
  0x18   : > { %p1144_p6 = por %p156_p0, %p42_p10  ;;  %s733_s27 = sshll.u32 %s210_s22, 3 }
  0x19   : > { %s734_s28 = sshll.u32 %s1020_s21, 3  ;;  %s214_s7 = scalar_lea.vmem [#allocation2], %s733_s27 }
  0x1a   : > { %s218_s6 = scalar_lea.hbm %s1264_s0, %s734_s28  ;;  %s222_s8 = sshll.u32 %s214_s7, 4  ;;  %s223_s8 = int_to_ptr.vmem [resolvable:$true] %s222_s8 }
  0x1b   : > { %s220_s9 = sshll.u32 %s218_s6, 4  ;;  %p1154_p7 = pnand %p787_p2, %p1127_p11  ;;  %s221_s9 = int_to_ptr.hbm [resolvable:$true] %s220_s9 }
  0x1c   : > { %s211_s11 = scalar_lea.sflag [#allocation3], %s210_s22  ;;  %s920_s13 = sshra.s32 %s221_s9, 4  ;;  %s921_s13 = int_to_ptr.hbm [resolvable:$true] %s920_s13 }
  0x1d   : > { %s922_s14 = scalar_lea.hbm %s921_s13, 8  ;;  %p924_p9 = pneg %p1154_p7 }
  0x1e   : > { %p923_p8 = scmp.ne.s32.totalorder %s921_s13, %s922_s14  ;;  %s927_s29 = scalar_lea.hbm %s1264_s0, 16 }
  0x1f   : > { %p928_p11 = scmp.lt.s32.totalorder %s921_s13, %s1264_s0  ;;  %p929_p0 = scmp.lt.s32.totalorder %s927_s29, %s922_s14 }
  0x20   : > { %p925_p10 = pnand %p924_p9, %p923_p8 }
  0x21   : > { %p930_p2 = por %p929_p0, %p928_p11 }
  0x22   : > { %p926_p13 = pneg %p925_p10 }
  0x24   : > { %p931_p5 = pnand %p930_p2, %p926_p13 }
  0x26   : > { %934 = shalt.err (!%p931_p5)
}
  0x27   : > { %780 = dma.hbm_to_vmem [thread:$0]  (!%p1154_p7), %s221_s9, 128, %s223_s8, %s211_s11  }
  0x28   : > { %231 = sbr.rel (%p1100_p3) target bundleno = 1102 (0x44e), region = 40  ;;  %s1171_s22 = sand.u32 (!%p1100_p3), 1, %s1012_s19  }
  0x29   : > { %s736_s6 = sshll.u32 (!%p1100_p3), %s1171_s22, 3  ;;  %s234_s7 = scalar_lea.sflag (!%p1100_p3), [#allocation3], %s1171_s22 }
  0x2a   : > { %s237_s13 = scalar_lea.vmem (!%p1100_p3), [#allocation2], %s736_s6 }
  0x2d   : > { %995 = dma.done.wait (%p1133_p12), %s234_s7, 128  }
  0x2e   : > { %997 = vsyncadd (%p1133_p12), %s234_s7, 4294967168 }
  0x2f   : > { %999 = dma.done.wait (%p43_p1), [#allocation6], 1024  }
  0x30   : > { %1001 = vsyncadd (%p43_p1), [#allocation6], 4294966272  ;;  %v279_v0 = vld [vmem:[#allocation5 + $0x18] sm:$0xff]  ;;  %v278_v1 = vld [vmem:[#allocation5 + $0x10] sm:$0xff]  ;;  %vm284_vm0 = vcmask 261120   ;;  %s1026_s8 = smov 72   ;;  %v308_v15 = vlaneseq }
  0x31   : > { %300 = vmatpush.msra.mxu0 %v279_v0  ;;  %v277_v2 = vld [vmem:[#allocation5 + $0x8] sm:$0xff]  ;;  %v276_v3 = vld [vmem:[#allocation5] sm:$0xff]  ;;  %v275_v4 = vld [vmem:[%s237_s13] sm:$0xff]  ;;  %s1027_s9 = smov 120   ;;  %s1028_s10 = smov 96   ;;  %vm317_vm1 = vcmask 64512  }
  0x32   : > { %v842_v5 = vld [vmem:[%s1266_s2] ss:$0 sm:$0xff]  ;;  %s1029_s11 = smov 112   ;;  %s1030_s14 = smov 80   ;;  %v309_v16 = vshrl.u32 %v308_v15, 7  ;;  %v311_v17 = vand.u32 127, %v308_v15 }
  0x33   : > { %301 = vmatpush.msra.mxu0 %v278_v1  ;;  %s1031_s27 = smov 88   ;;  %s1032_s28 = smov 104   ;;  %v1033_v18 = vmov -1e+30   ;;  %vm587_vm3 = vcmask 130048   ;;  %vm589_vm4 = vcmask 195584  }
  0x34   : > { %vm312_vm2 = vcmp.le.s32.totalorder %v311_v17, %v309_v16  ;;  %s1034_s29 = smov 64   ;;  %s1035_s30 = smov 40  }
  0x35   : > { %302 = vmatpush.msra.mxu0 %v277_v2  ;;  %v313_v19 = vsel %vm312_vm2, 0.0, %v1033_v18  ;;  %s1036_s16 = smov 56   ;;  %s1037_s7 = smov 48   ;;  %v843_v18 = vld [vmem:[%s1268_s4] ss:$0 sm:$0xff] }
  0x36   : > { %s1038_s13 = smov 16   ;;  %s1039_s26 = smov 8  }
  0x37   : > { %303 = vmatpush.msra.mxu0 %v276_v3  ;;  %s1040_s17 = smov 24  }
  0x38   : > { %740 = vmatmul.msk.f32.vlgmr.msra.gmra.mxu0 %vm284_vm0, %v275_v4 }
  0xb5   : > { %v305_v6 = vpop.f32.mrf.mxu0 }
  0xb6   : > { %v1189_v7 = vadd.f32 %v842_v5, %v305_v6 }
  0xb8   : > { %511 = vrot.lane.b32.xlu2 %v1189_v7, %s1026_s8  ;;  %379 = vrot.lane.b32.xlu1 %v1189_v7, %s1027_s9  ;;  %s755_s8 = sshll.u32 %s1095_s25, 3  ;;  %s624_s25 = scalar_lea.sflag [#allocation4], %s1171_s22 }
  0xb9   : > { %315 = vrot.lane.b32.xlu0 %v1189_v7, %s1028_s10 }
  0xc0   : > { %444 = vrot.lane.b32.xlu2 %v1189_v7, %s1029_s11  ;;  %446 = vrot.lane.b32.xlu1 %v1189_v7, %s1030_s14  ;;  %s634_s11 = scalar_lea.hbm %s1269_s5, %s755_s8 }
  0xc1   : > { %381 = vrot.lane.b32.xlu0 %v1189_v7, %s1031_s27 }
  0xc9   : > { %509 = vrot.lane.b32.xlu0 %v1189_v7, %s1032_s28  ;;  %s274_s28 = scalar_lea.vmem [#allocation8], %s736_s6  ;;  %s970_s6 = scalar_lea.hbm %s1269_s5, 16 }
 0x112   : > { %v512_v8 = vpop.permute.xlu2 %511 }
 0x113   : > { %750 = vmatpush.xpose.msk.msrb.mxu0 %vm317_vm1, %v512_v8  ;;  %v594_v8 = vld [vmem:[#allocation7 + $0x18] sm:$0xff] }
 0x11a   : > { %v445_v13 = vpop.permute.xlu2 %444 }
 0x12a   : > { %v380_v9 = vpop.permute.xlu1 %379 }
 0x12b   : > { %v316_v10 = vpop.permute.xlu0 %315 }
 0x12c   : > { %741 = vmatpush.xpose.msk.msra.mxu1 %vm317_vm1, %v316_v10  ;;  %v592_v10 = vld [vmem:[#allocation7 + $0x8] sm:$0xff] }
 0x12f   : > { %742 = vmatmul.msk.f32.vlgmr.msra.gmra.mxu1 %vm317_vm1, %v1189_v7 }
 0x132   : > { %v447_v11 = vpop.permute.xlu1 %446 }
 0x133   : > { %v382_v12 = vpop.permute.xlu0 %381  ;;  %747 = vmatpush.xpose.msk.msrb.mxu1 %vm317_vm1, %v447_v11  ;;  %v591_v11 = vld [vmem:[#allocation7] sm:$0xff] }
 0x134   : > { %744 = vmatpush.xpose.msk.msra.mxu3 %vm317_vm1, %v382_v12 }
 0x137   : > { %745 = vmatmul.msk.f32.vlgmr.msra.gmra.mxu3 %vm317_vm1, %v380_v9  ;;  %748 = vmatmul.msk.f32.vlgmr.msrb.gmra.mxu1 %vm317_vm1, %v445_v13  ;;  %v593_v9 = vld [vmem:[#allocation7 + $0x10] sm:$0xff] }
 0x138   : > { %614 = vmatpush.msra.mxu1 %v594_v8 }
 0x13a   : > { %615 = vmatpush.msra.mxu1 %v593_v9 }
 0x13b   : > { %v510_v14 = vpop.permute.xlu0 %509 }
 0x13c   : > { %751 = vmatmul.msk.f32.vlgmr.msrb.gmra.mxu0 %vm317_vm1, %v510_v14  ;;  %616 = vmatpush.msra.mxu1 %v592_v10 }
 0x13e   : > { %617 = vmatpush.msra.mxu1 %v591_v11 }
 0x1ac   : > { %v339_v20 = vpop.f32.mrf.mxu1 }
 0x1ad   : > { %v340_v21 = vadd.f32 %v339_v20, %v313_v19 }
 0x1af   : > { %v342_v22 = vsel %vm317_vm1, %v340_v21, -inf }
 0x1b0   : > { %343 = vmax.xlane.f32.xlu1 %v342_v22 }
 0x1b4   : > { %v469_v23 = vpop.f32.mrf.mxu1 }
 0x1b5   : > { %v470_v24 = vadd.f32 %v469_v23, %v313_v19 }
 0x1b7   : > { %v472_v25 = vsel %vm317_vm1, %v470_v24, -inf }
 0x1b8   : > { %473 = vmax.xlane.f32.xlu0 %v472_v25 }
 0x1b9   : > { %v534_v29 = vpop.f32.mrf.mxu0 }
 0x1ba   : > { %v404_v26 = vpop.f32.mrf.mxu3  ;;  %v535_v30 = vadd.f32 %v534_v29, %v313_v19 }
 0x1bb   : > { %v405_v27 = vadd.f32 %v404_v26, %v313_v19 }
 0x1bc   : > { %v537_v31 = vsel %vm317_vm1, %v535_v30, -inf }
 0x1bd   : > { %v407_v28 = vsel %vm317_vm1, %v405_v27, -inf }
 0x1be   : > { %408 = vmax.xlane.f32.xlu2 %v407_v28 }
 0x1c6   : > { %538 = vmax.xlane.f32.xlu2 %v537_v31 }
 0x1cc   : > { %353 = vrot.lane.b32.xlu0 %v1189_v7, %s1034_s29  ;;  %s636_s29 = sshll.u32 %s274_s28, 4  ;;  %s637_s29 = int_to_ptr.vmem [resolvable:$true] %s636_s29 }
 0x1d4   : > { %548 = vrot.lane.b32.xlu0 %v1189_v7, %s1035_s30  ;;  %s638_s30 = sshll.u32 %s634_s11, 4  ;;  %s639_s30 = int_to_ptr.hbm [resolvable:$true] %s638_s30 }
 0x223   : > { %v344_v32 = vpop.xlane.xlu1 %343 }
 0x224   : > { %v345_v33 = vsub.f32 %v340_v21, %v344_v32 }
 0x226   : > { %v346_v34 = vmul.f32 1.442695, %v345_v33 }
 0x228   : > { %844 = vpow2.f32 %v346_v34 }
 0x22b   : > { %v474_v35 = vpop.xlane.xlu0 %473 }
 0x22c   : > { %v475_v36 = vsub.f32 %v470_v24, %v474_v35 }
 0x22e   : > { %v845_v37 = vpop.eup %844  ;;  %v476_v38 = vmul.f32 1.442695, %v475_v36 }
 0x22f   : > { %v348_v39 = vsel %vm317_vm1, %v845_v37, 0.0 }
 0x230   : > { %846 = vpow2.f32 %v476_v38  ;;  %349 = vadd.xlane.f32.xlu1 %v348_v39 }
 0x231   : > { %v409_v40 = vpop.xlane.xlu2 %408 }
 0x232   : > { %v410_v45 = vsub.f32 %v405_v27, %v409_v40 }
 0x234   : > { %v411_v48 = vmul.f32 1.442695, %v410_v45 }
 0x236   : > { %v847_v41 = vpop.eup %846 }
 0x237   : > { %v478_v42 = vsel %vm317_vm1, %v847_v41, 0.0 }
 0x238   : > { %479 = vadd.xlane.f32.xlu1 %v478_v42 }
 0x239   : > { %v539_v43 = vpop.xlane.xlu2 %538 }
 0x23a   : > { %v540_v44 = vsub.f32 %v535_v30, %v539_v43 }
 0x23c   : > { %v541_v46 = vmul.f32 1.442695, %v540_v44 }
 0x23e   : > { %848 = vpow2.f32 %v541_v46  ;;  %v354_v47 = vpop.permute.xlu0 %353 }
 0x23f   : > { %374 = vmatpush.msra.mxu2 %v354_v47  ;;  %850 = vpow2.f32 %v411_v48 }
 0x244   : > { %v849_v49 = vpop.eup %848 }
 0x245   : > { %v543_v50 = vsel %vm317_vm1, %v849_v49, 0.0  ;;  %v851_v51 = vpop.eup %850 }
 0x246   : > { %544 = vadd.xlane.f32.xlu2 %v543_v50  ;;  %v413_v52 = vsel %vm317_vm1, %v851_v51, 0.0  ;;  %v549_v60 = vpop.permute.xlu0 %548 }
 0x24e   : > { %414 = vadd.xlane.f32.xlu2 %v413_v52 }
 0x251   : > { %418 = vrot.lane.b32.xlu1 %v1189_v7, %s1036_s16  ;;  %s964_s16 = sshra.s32 %s639_s30, 4  ;;  %s965_s16 = int_to_ptr.hbm [resolvable:$true] %s964_s16 }
 0x252   : > { %p971_p12 = scmp.lt.s32.totalorder %s965_s16, %s1269_s5 }
 0x266   : > { %483 = vrot.lane.b32.xlu2 %v1189_v7, %s1037_s7  ;;  %s966_s7 = scalar_lea.hbm %s965_s16, 8 }
 0x267   : > { %p967_p1 = scmp.ne.s32.totalorder %s965_s16, %s966_s7  ;;  %p972_p7 = scmp.lt.s32.totalorder %s970_s6, %s966_s7 }
 0x269   : > { %p968_p3 = pnand %p967_p1, %p1140_p4  ;;  %p973_p8 = por %p972_p7, %p971_p12 }
 0x26b   : > { %p969_p5 = pneg %p968_p3 }
 0x26d   : > { %p974_p9 = pnand %p973_p8, %p969_p5 }
 0x2a3   : > { %v350_v53 = vpop.xlane.xlu1 %349 }
 0x2a4   : > { %852 = vrcp.f32 %v350_v53 }
 0x2aa   : > { %v853_v54 = vpop.eup %852 }
 0x2ab   : > { %v352_v55 = vmul.f32 %v853_v54, %v845_v37  ;;  %v480_v57 = vpop.xlane.xlu1 %479 }
 0x2ac   : > { %854 = vrcp.f32 %v480_v57 }
 0x2ad   : > { %743 = vmatmul.msk.f32.vlgmr.msra.gmra.mxu2 %vm317_vm1, %v352_v55 }
 0x2b2   : > { %v855_v61 = vpop.eup %854 }
 0x2b3   : > { %v482_v1 = vmul.f32 %v855_v61, %v847_v41 }
 0x2b9   : > { %v545_v56 = vpop.xlane.xlu2 %544 }
 0x2c1   : > { %v415_v58 = vpop.xlane.xlu2 %414 }
 0x2c2   : > { %856 = vrcp.f32 %v415_v58 }
 0x2c3   : > { %v419_v59 = vpop.permute.xlu1 %418  ;;  %858 = vrcp.f32 %v545_v56 }
 0x2c4   : > { %439 = vmatpush.msrb.mxu2 %v419_v59 }
 0x2c6   : > { %569 = vmatpush.msra.mxu2 %v549_v60 }
 0x2c8   : > { %v857_v62 = vpop.eup %856 }
 0x2c9   : > { %v484_v63 = vpop.permute.xlu2 %483  ;;  %v417_v0 = vmul.f32 %v857_v62, %v851_v51  ;;  %v859_v2 = vpop.eup %858 }
 0x2ca   : > { %504 = vmatpush.msrb.mxu3 %v484_v63  ;;  %v547_v3 = vmul.f32 %v859_v2, %v849_v49 }
 0x2cb   : > { %746 = vmatmul.msk.f32.vlgmr.msrb.gmra.mxu2 %vm317_vm1, %v417_v0  ;;  %749 = vmatmul.msk.f32.vlgmr.msrb.gmra.mxu3 %vm317_vm1, %v482_v1 }
 0x2d3   : > { %752 = vmatmul.msk.f32.vlgmr.msra.gmra.mxu2 %vm317_vm1, %v547_v3 }
 0x330   : > { %v376_v4 = vpop.f32.mrf.mxu2 }
 0x34e   : > { %v441_v5 = vpop.f32.mrf.mxu2  ;;  %v506_v6 = vpop.f32.mrf.mxu3 }
 0x34f   : > { %579 = vrot.lane.b32.xlu1 %v506_v6, %s1038_s13  ;;  %575 = vrot.lane.b32.xlu0 %v441_v5, %s1039_s26 }
 0x356   : > { %v571_v7 = vpop.f32.mrf.mxu2 }
 0x357   : > { %583 = vrot.lane.b32.xlu0 %v571_v7, %s1040_s17 }
 0x3c1   : > { %v576_v12 = vpop.permute.xlu0 %575  ;;  %v580_v13 = vpop.permute.xlu1 %579 }
 0x3c2   : > { %v586_v14 = vsel %vm317_vm1, %v376_v4, %v576_v12 }
 0x3c3   : > { %v588_v15 = vsel %vm587_vm3, %v586_v14, %v580_v13 }
 0x3c9   : > { %v584_v16 = vpop.permute.xlu0 %583 }
 0x3ca   : > { %v590_v17 = vsel %vm589_vm4, %v588_v15, %v584_v16 }
 0x3cb   : > { %753 = vmatmul.msk.f32.vlgmr.msra.gmra.mxu1 %vm284_vm0, %v590_v17 }
 0x448   : > { %v619_v19 = vpop.f32.mrf.mxu1 }
 0x449   : > { %v620_v20 = vadd.f32 %v843_v18, %v619_v19 }
 0x44b   : > { %622 = vst.msk [vmem:[%s274_s28] sm:$0xff] %vm284_vm0, %v620_v20 }
 0x44c   : > { %977 = shalt.err (!%p974_p9)
}
 0x44d   : > { %768 = dma.vmem_to_hbm [thread:$0]  (%p1140_p4), %s637_s29, 128, %s639_s30, %s624_s25  }
 0x44e PF: > { %s650_s22 = sand.u32 1, %s1008_s18   ;;  %p1276_p10 = scmp.ge.s32.totalorder %s1020_s21, 2 }
 0x44f   : > { %s651_s9 = scalar_lea.sflag [#allocation4], %s650_s22 }
 0x450   : > { %p782_p13 = pnand %p1276_p10, %p1144_p6 }
 0x452   : > { %p783_p11 = pneg %p782_p13 }
 0x454   : > { %1003 = dma.done.wait (%p783_p11), %s651_s9, 128  }
 0x455   : > { %1005 = vsyncadd (%p783_p11), %s651_s9, 4294967168  ;;  %p19_p0 = scmp.ge.s32.totalorder %s1114_s12, 4   ;;  %s1277_s18 = smov %s1012_s19 }
 0x456   : > { %s1278_s19 = smov %s1016_s20  ;;  %s1279_s20 = smov %s1125_s15 }
 0x457   : > { %s1280_s21 = smov %s1114_s12  ;;  %21 = sbr.rel (!%p19_p0) target bundleno = 6 (0x6), region = 93 }
 0x45c   :  { %657 = vsyncpa [#allocation3], 1 }
 0x45d   :  { %659 = vsyncpa [#allocation3 + $0x1], 1 }
 0x45e   :  { %660 = vsyncpa [#allocation6], 1 }
 0x45f   :  { %661 = vsyncpa [#allocation4], 1 }
 0x460   :  { %663 = vsyncpa [#allocation4 + $0x1], 1 }

</bundles_post_ra>
